<compile_context>
chip_gen: v7x
topology: tpu7x:2x2x1
jax: 0.10.0
libtpu: 0.0.40
codegen_flags: <defaults>
</compile_context>

<pallas_src>
import functools

import jax
import jax.numpy as jnp
from jax.experimental import pallas as pl
from jax.experimental.pallas import tpu as pltpu


# ---------------------------------------------------------------------------
# Token-tiled linear kernels (weights VMEM-resident across the M grid).
# ---------------------------------------------------------------------------
def _matmul_kernel(x_ref, w_ref, o_ref):
    y = jnp.dot(x_ref[...], w_ref[...], preferred_element_type=jnp.float32)
    o_ref[...] = y.astype(o_ref.dtype)


def _matmul_bias_kernel(x_ref, w_ref, b_ref, o_ref):
    y = jnp.dot(x_ref[...], w_ref[...], preferred_element_type=jnp.float32)
    y = y + b_ref[...].astype(jnp.float32)
    o_ref[...] = y.astype(o_ref.dtype)


def _pick_tm(m):
    # TM=256 is safe on all generations (v7x: 64 MiB VMEM); smaller inputs get
    # a single full-extent block.
    return 256 if m > 256 else m


def _linear(x2d, w, b=None):
    """x2d: (M, K) @ w: (K, Nout) [+ b]  -> (M, Nout), tiled over M."""
    m, k_dim = x2d.shape
    n_out = w.shape[1]
    tm = _pick_tm(m)
    grid = (pl.cdiv(m, tm),)

    in_specs = [
        pl.BlockSpec((tm, k_dim), lambda i: (i, 0)),       # x tile (pipelined)
        pl.BlockSpec((k_dim, n_out), lambda i: (0, 0)),    # weight resident
    ]
    args = [x2d, w]
    if b is not None:
        in_specs.append(pl.BlockSpec((1, n_out), lambda i: (0, 0)))
        args.append(b.reshape(1, n_out))
        kernel = _matmul_bias_kernel
    else:
        kernel = _matmul_kernel

    flops = 2 * m * k_dim * n_out
    bytes_accessed = (m * k_dim + k_dim * n_out + m * n_out) * x2d.dtype.itemsize

    return pl.pallas_call(
        kernel,
        out_shape=jax.ShapeDtypeStruct((m, n_out), x2d.dtype),
        grid=grid,
        in_specs=in_specs,
        out_specs=pl.BlockSpec((tm, n_out), lambda i: (i, 0)),
        compiler_params=pltpu.CompilerParams(
            dimension_semantics=("parallel",),
            vmem_limit_bytes=48 * 1024 * 1024,
        ),
        cost_estimate=pl.CostEstimate(
            flops=flops, transcendentals=0, bytes_accessed=bytes_accessed),
    )(*args)


# ---------------------------------------------------------------------------
# Per-batch attention kernel: scale + softmax + PV with in-kernel value mixing.
#   w_ref      : (n_mix,) mix weights in SMEM (scalar prefetch)
#   q/k/v refs : (1, N, heads*dim_head)   token-major layout
#   mix refs   : n_mix * (1, heads, N, dim_head)
#   o_ref      : (1, N, heads*dim_head)   lane-dense single store
# ---------------------------------------------------------------------------
def _attn_kernel(w_ref, q_ref, k_ref, v_ref, *rest, scale, heads, dim_head, n_mix):
    mix_refs = rest[:n_mix]
    o_ref = rest[n_mix]

    outs = []
    for h in range(heads):                               # static unroll over heads
        sl = slice(h * dim_head, (h + 1) * dim_head)
        q_h = q_ref[0, :, sl]                            # (N, d), native dtype
        k_h = k_ref[0, :, sl]                            # (N, d)

        # q @ k^T on the MXU, f32 accumulation, then scale.
        s = jax.lax.dot_general(
            q_h, k_h, (((1,), (1,)), ((), ())),
            preferred_element_type=jnp.float32) * scale   # (N, N) f32

        # Numerically stable softmax over the key axis.
        s = s - jnp.max(s, axis=-1, keepdims=True)
        e = jnp.exp(s)
        attn = e / jnp.sum(e, axis=-1, keepdims=True)     # (N, N) f32

        # Fold mixed values via linearity of matmul:
        #   attn @ v + sum_i w_i*(attn @ mix_i) == attn @ (v + sum_i w_i*mix_i)
        v_h = v_ref[0, :, sl]
        for i in range(n_mix):                            # static unroll
            v_h = v_h + mix_refs[i][0, h] * w_ref[i]

        p = attn.astype(v_h.dtype)
        outs.append(jnp.dot(p, v_h, preferred_element_type=jnp.float32))

    # Single lane-dense store of the full (N, heads*dim_head) slab.
    o_ref[0] = jnp.concatenate(outs, axis=-1).astype(o_ref.dtype)


# ---------------------------------------------------------------------------
# Full forward pass.
# ---------------------------------------------------------------------------
def attention_forward(x, w_qkv, w_out, b_out, mix_weight, v_odd, *, heads, dim_head):
    """x: (B, N, dim).  Returns (y, q, k, v) like the PyTorch module."""
    B, N, dim = x.shape
    inner = heads * dim_head
    scale = dim_head ** (-0.5)
    M = B * N
    project_out = not (heads == 1 and dim_head == dim)

    # ---- QKV projection (no bias), tiled over tokens. ----
    qkv2d = _linear(x.reshape(M, dim), w_qkv)                 # (M, 3*inner)
    q2d, k2d, v2d = jnp.split(qkv2d, 3, axis=-1)

    # Token-major layout for the attention kernel (no transpose needed).
    q_t = q2d.reshape(B, N, inner)
    k_t = k2d.reshape(B, N, inner)
    v_t = v2d.reshape(B, N, inner)

    # Head-major layout only for the module's return values.
    def to_heads(t):  # (M, inner) -> (B, heads, N, dim_head)
        return t.reshape(B, N, heads, dim_head).transpose(0, 2, 1, 3)

    q = to_heads(q2d)
    k = to_heads(k2d)
    v = to_heads(v2d)

    # ---- Gather non-None mix values (kept in their native b h n d layout). ----
    mix_tensors = []
    mix_w = []
    for i, vm in enumerate(v_odd):
        if vm is not None:
            mix_tensors.append(vm.astype(x.dtype))
            mix_w.append(mix_weight[i])
    n_mix = len(mix_tensors)
    if n_mix:
        w_arr = jnp.stack(mix_w).astype(jnp.float32)          # (n_mix,) -> SMEM
    else:
        w_arr = jnp.zeros((1,), dtype=jnp.float32)            # dummy, unused

    # ---- Fused scale + softmax + PV per batch element (all heads in-kernel). ----
    kernel = functools.partial(
        _attn_kernel, scale=scale, heads=heads, dim_head=dim_head, n_mix=n_mix)

    in_specs = (
        [pl.BlockSpec((1, N, inner), lambda b, w: (b, 0, 0))] * 3
        + [pl.BlockSpec((1, heads, N, dim_head), lambda b, w: (b, 0, 0, 0))] * n_mix
    )

    itemsize = x.dtype.itemsize
    attn_flops = B * heads * (4 * N * N * dim_head)           # QK^T + PV
    attn_bytes = (4 + n_mix) * B * N * inner * itemsize

    out_t = pl.pallas_call(
        kernel,
        out_shape=jax.ShapeDtypeStruct((B, N, inner), x.dtype),
        grid_spec=pltpu.PrefetchScalarGridSpec(
            num_scalar_prefetch=1,
            grid=(B,),
            in_specs=in_specs,
            out_specs=pl.BlockSpec((1, N, inner), lambda b, w: (b, 0, 0)),
        ),
        compiler_params=pltpu.CompilerParams(
            dimension_semantics=("parallel",),
            vmem_limit_bytes=48 * 1024 * 1024,
        ),
        cost_estimate=pl.CostEstimate(
            flops=attn_flops, transcendentals=B * heads * N * N,
            bytes_accessed=attn_bytes),
    )(w_arr, q_t, k_t, v_t, *mix_tensors)                     # (B, N, inner)

    out2d = out_t.reshape(M, inner)

    # ---- Output projection (identity if not project_out). ----
    if project_out:
        y2d = _linear(out2d, w_out, b_out)                    # (M, dim)
    else:
        y2d = out2d
    # TODO(synk): Dropout in to_out omitted (p=0.0 / eval mode -> identity)

    return y2d.reshape(B, N, -1), q, k, v


# ---------------------------------------------------------------------------
# Pure-JAX reference (matches the PyTorch op-by-op order).
# ---------------------------------------------------------------------------
def reference_attention(x, w_qkv, w_out, b_out, mix_weight, v_odd, *, heads, dim_head):
    B, N, dim = x.shape
    inner = heads * dim_head
    hi = jax.lax.Precision.HIGHEST

    qkv = jnp.einsum("bnd,de->bne", x, w_qkv, precision=hi)
    q2, k2, v2 = jnp.split(qkv, 3, axis=-1)

    def to_heads(t):
        return t.reshape(B, N, heads, dim_head).transpose(0, 2, 1, 3)

    q, k, v = to_heads(q2), to_heads(k2), to_heads(v2)
    dots = jnp.einsum("bhnd,bhmd->bhnm", q, k, precision=hi) * (dim_head ** (-0.5))
    attn = jax.nn.softmax(dots, axis=-1)
    out = jnp.einsum("bhnm,bhmd->bhnd", attn, v, precision=hi)
    for i, vm in enumerate(v_odd):
        if vm is not None:
            out = out + jnp.einsum("bhnm,bhmd->bhnd", attn, vm, precision=hi) * mix_weight[i]
    out = out.transpose(0, 2, 1, 3).reshape(B, N, inner)
    y = jnp.einsum("bne,ed->bnd", out, w_out, precision=hi) + b_out
    return y, q, k, v


if __name__ == "__main__":
    B, N, dim = 2, 8, 32
    heads, dim_head = 4, 16
    inner = heads * dim_head

    key = jax.random.PRNGKey(0)
    kx, kqkv, kout, kb, kmix, kv1, kv2 = jax.random.split(key, 7)

    x = jax.random.normal(kx, (B, N, dim), dtype=jnp.float32)
    w_qkv = jax.random.normal(kqkv, (dim, inner * 3), dtype=jnp.float32) * 0.02
    w_out = jax.random.normal(kout, (inner, dim), dtype=jnp.float32) * 0.02
    b_out = jax.random.normal(kb, (dim,), dtype=jnp.float32) * 0.02
    mix_weight = jax.random.normal(kmix, (12,), dtype=jnp.float32)

    # v_odd list with some None entries (as in the PyTorch forward loop).
    v_mix0 = jax.random.normal(kv1, (B, heads, N, dim_head), dtype=jnp.float32)
    v_mix2 = jax.random.normal(kv2, (B, heads, N, dim_head), dtype=jnp.float32)
    v_odd = [v_mix0, None, v_mix2]

    y, q, k, v = attention_forward(
        x, w_qkv, w_out, b_out, mix_weight, v_odd, heads=heads, dim_head=dim_head)
    jax.block_until_ready(y)

    y_r, q_r, k_r, v_r = reference_attention(
        x, w_qkv, w_out, b_out, mix_weight, v_odd, heads=heads, dim_head=dim_head)

    assert y.shape == (B, N, dim)
    assert q.shape == (B, heads, N, dim_head)
    for got, want in ((y, y_r), (q, q_r), (k, k_r), (v, v_r)):
        assert jnp.allclose(got, want, atol=1e-4, rtol=1e-4), float(
            jnp.max(jnp.abs(got - want)))

    print("KERNEL_OK")
</pallas_src>

<mosaic_0001>
module attributes {stable_mosaic.version = 11 : i64} {
  func.func @_matmul_kernel(%arg0: i32, %arg1: memref<16x32xf32, #tpu.memory_space<vmem>>, %arg2: memref<32x192xf32, #tpu.memory_space<vmem>>, %arg3: memref<16x192xf32, #tpu.memory_space<vmem>>) attributes {dimension_semantics = [#tpu.dimension_semantics<parallel>], iteration_bounds = array<i64: 1>, scalar_prefetch = 0 : i64, scratch_operands = 0 : i64, tpu.core_type = #tpu.core_type<tc>, window_params = [{transform_indices = @transform_0, window_bounds = array<i64: 16, 32>}, {pipeline_mode = #tpu.pipeline_mode<synchronous>, transform_indices = @transform_1, window_bounds = array<i64: 32, 192>}, {transform_indices = @transform_2, window_bounds = array<i64: 16, 192>}]} {
    %c0 = arith.constant 0 : index
    %c0_0 = arith.constant 0 : index
    %0 = vector.load %arg1[%c0, %c0_0] : memref<16x32xf32, #tpu.memory_space<vmem>>, vector<16x32xf32>
    %c0_1 = arith.constant 0 : index
    %c0_2 = arith.constant 0 : index
    %1 = vector.load %arg2[%c0_1, %c0_2] : memref<32x192xf32, #tpu.memory_space<vmem>>, vector<32x192xf32>
    %cst = arith.constant dense<0.000000e+00> : vector<16x192xf32>
    %2 = tpu.matmul %0, %1, %cst {dimension_numbers = #tpu.dot_dimension_numbers<[1], [0], [0], [1], [0, 0, 1, 1], [], []>} : vector<16x32xf32>, vector<32x192xf32>, vector<16x192xf32> -> vector<16x192xf32>
    %c0_3 = arith.constant 0 : index
    %c0_4 = arith.constant 0 : index
    %3 = vector.load %arg3[%c0_3, %c0_4] : memref<16x192xf32, #tpu.memory_space<vmem>>, vector<16x192xf32>
    tpu.vector_store %arg3[%c0_3, %c0_4], %2 {strides = array<i32>} : memref<16x192xf32, #tpu.memory_space<vmem>>, vector<16x192xf32>,
    return
  }
  func.func @transform_0(%arg0: i32) -> (i32, i32) {
    %c0_i32 = arith.constant 0 : i32
    %c0_i32_0 = arith.constant 0 : i32
    return %arg0, %c0_i32 : i32, i32
  }
  func.func @transform_1(%arg0: i32) -> (i32, i32) {
    %c0_i32 = arith.constant 0 : i32
    %c0_i32_0 = arith.constant 0 : i32
    %c0_i32_1 = arith.constant 0 : i32
    return %c0_i32, %c0_i32_0 : i32, i32
  }
  func.func @transform_2(%arg0: i32) -> (i32, i32) {
    %c0_i32 = arith.constant 0 : i32
    %c0_i32_0 = arith.constant 0 : i32
    return %arg0, %c0_i32 : i32, i32
  }
}

</mosaic_0001>

<bundles_post_ra>
// kernel: tpu_custom_call.1
= control target key start
LH: loop header
LB: loop body
LE: loop exit
PB: predicated region body
PF: predicated region fallthrough
CT: control target
= control target key end

     0   :  { %7 = vsyncpa [#allocation3], 0  ;;  %s316_s0 = inlined_call_operand.hbm [shape: f32[16,32], index: 0, kind: input, shape index: {}]   ;;  %s317_s1 = inlined_call_operand.hbm [shape: f32[32,192], index: 1, kind: input, shape index: {}]   ;;  %s318_s2 = inlined_call_operand.hbm [shape: f32[16,192], index: 2, kind: output, shape index: {}]  }
   0x1   :  { %8 = vsyncpa [#allocation6], 0 }
   0x2   :  { %9 = vsyncpa [#allocation4], 0  ;;  %s251_s9 = smov [#allocation2]   ;;  %s179_s13 = scalar_lea.hbm %s316_s0, 256 }
   0x3   :  { %s15_s10 = sshll.u32 %s251_s9, 4  ;;  %p180_p0 = scmp.ne.s32.totalorder %s316_s0, %s179_s13  ;;  %s16_s10 = int_to_ptr.vmem [resolvable:$true] %s15_s10 }
   0x4   :  { %p183_p1 = scmp.lt.u32.totalorder %s179_s13, %s316_s0 }
   0x6   :  { %p185_p2 = pnand %p183_p1, %p180_p0 }
   0x8   :  { %188 = shalt.err (!%p185_p2)
}
   0x9   :  { %s189_s18 = scalar_lea.vmem %s16_s10, 256  ;;  %p194_p4 = scmp.lt.s32.totalorder %s16_s10, %s16_s10 }
   0xa   :  { %p190_p3 = scmp.ne.s32.totalorder %s16_s10, %s189_s18  ;;  %p195_p5 = scmp.lt.s32.totalorder %s189_s18, %s189_s18 }
   0xc   :  { %p196_p6 = por %p195_p5, %p194_p4 }
   0xe   :  { %p197_p7 = pnand %p196_p6, %p190_p3 }
  0x10   :  { %200 = shalt.err (!%p197_p7)
}
  0x11   :  { %s252_s19 = smov 128   ;;  %s253_s20 = smov 8  }
  0x12   :  { %21 = dma.hbm_to_vmem [thread:$0]  %s316_s0, 256, %s16_s10, [#allocation3], %s252_s19, %s252_s19, %s253_s20  }
  0x13   :  { %s254_s23 = smov [#allocation5]   ;;  %s201_s27 = scalar_lea.hbm %s317_s1, 1024 }
  0x14   :  { %s27_s24 = sshll.u32 %s254_s23, 4  ;;  %p202_p8 = scmp.ne.s32.totalorder %s317_s1, %s201_s27  ;;  %s28_s24 = int_to_ptr.vmem [resolvable:$true] %s27_s24 }
  0x15   :  { %p205_p9 = scmp.lt.u32.totalorder %s201_s27, %s317_s1 }
  0x17   :  { %p207_p10 = pnand %p205_p9, %p202_p8 }
  0x19   :  { %210 = shalt.err (!%p207_p10)
}
  0x1a   :  { %s211_s4 = scalar_lea.vmem %s28_s24, 1024  ;;  %p216_p12 = scmp.lt.s32.totalorder %s28_s24, %s28_s24 }
  0x1b   :  { %p212_p11 = scmp.ne.s32.totalorder %s28_s24, %s211_s4  ;;  %p217_p13 = scmp.lt.s32.totalorder %s211_s4, %s211_s4 }
  0x1d   :  { %p218_p0 = por %p217_p13, %p216_p12 }
  0x1f   :  { %p219_p1 = pnand %p218_p0, %p212_p11 }
  0x21   :  { %222 = shalt.err (!%p219_p1)
}
  0x22   :  { %s255_s0 = smov 256   ;;  %s256_s5 = smov 16  }
  0x23   :  { %33 = dma.hbm_to_vmem [thread:$0]  %s317_s1, 1024, %s28_s24, [#allocation6], %s255_s0, %s255_s0, %s256_s5  }
  0x24   :  { %245 = dma.done.wait [#allocation3], 256  }
  0x25   :  { %246 = vsyncadd [#allocation3], 4294967040 }
  0x26   :  { %247 = dma.done.wait [#allocation6], 1024  }
  0x27   :  { %248 = vsyncadd [#allocation6], 4294966272  ;;  %v257_v0 = vmov 0.0   ;;  %v43_v1 = vld [vmem:[#allocation5 + $0x8] sm:$0xff]  ;;  %v45_v2 = vld [vmem:[#allocation5 + $0x18] sm:$0xff]  ;;  %vm50_vm0 = vcmask 261120  }
  0x28   :  { %121 = vmatprep.mubr.f32.mxu0 %v257_v0  ;;  %127 = vmatprep.mubr.f32.mxu1 %v257_v0  ;;  %v42_v3 = vld [vmem:[#allocation5] sm:$0xff]  ;;  %v159_v4 = vpack.c.bf16 %v45_v2, %v43_v1  ;;  %v44_v5 = vld [vmem:[#allocation5 + $0x10] sm:$0xff]  ;;  %v47_v6 = vld [vmem:[#allocation5 + $0x28] sm:$0xff]  ;;  %s258_s1 = smov [#allocation7]   ;;  %vm135_vm1 = vcmask 523264  }
  0x29   :  { %v49_v7 = vld [vmem:[#allocation5 + $0x38] sm:$0xff]  ;;  %v161_v8 = vpack.c.bf16 %v44_v5, %v42_v3  ;;  %v46_v10 = vld [vmem:[#allocation5 + $0x20] sm:$0xff]  ;;  %v48_v11 = vld [vmem:[#allocation5 + $0x30] sm:$0xff]  ;;  %s144_s8 = sshll.u32 %s258_s1, 4  ;;  %s145_s8 = int_to_ptr.vmem [resolvable:$true] %s144_s8 }
  0x2a   :  { %v163_v9 = vpack.c.bf16 %v49_v7, %v47_v6  ;;  %160 = vmatprep.subr.bf16.mxu0 %v159_v4  ;;  %167 = vmatprep.subr.bf16.mxu1 %v159_v4  ;;  %v165_v12 = vpack.c.bf16 %v48_v11, %v46_v10  ;;  %v40_v13 = vld [vmem:[#allocation2] sm:$0xff]  ;;  %v41_v14 = vld [vmem:[#allocation2 + $0x8] sm:$0xff]  ;;  %s223_s9 = scalar_lea.vmem %s145_s8, 512  ;;  %p228_p3 = scmp.lt.s32.totalorder %s145_s8, %s145_s8 }
  0x2b   :  { %162 = vmatpush1.bf16.msra.mxu0 %v161_v8  ;;  %169 = vmatpush1.bf16.msra.mxu1 %v161_v8  ;;  %p224_p2 = scmp.ne.s32.totalorder %s145_s8, %s223_s9  ;;  %p229_p4 = scmp.lt.s32.totalorder %s223_s9, %s223_s9 }
  0x2c   :  { %164 = vmatprep.subr.bf16.mxu0 %v163_v9  ;;  %168 = vmatprep.subr.bf16.mxu1 %v163_v9 }
  0x2d   :  { %p230_p5 = por %p229_p4, %p228_p3 }
  0x2f   :  { %166 = vmatpush1.bf16.msra.mxu0 %v165_v12  ;;  %170 = vmatpush1.bf16.msra.mxu1 %v165_v12  ;;  %p231_p6 = pnand %p230_p5, %p224_p2 }
  0x32   :  { %157 = vmatmul.mubr.msk.f32.vlgmr.msra.gmra.mrb[0].mxu0 %vm50_vm0, %v40_v13  ;;  %158 = vmatmul.mubr.msk.f32.vlgmr.msra.gmra.mrb[0].mxu1 %vm50_vm0, %v41_v14 }
 0x105   :  { %v123_v15 = vpop.f32.mrb[0].mxu0  ;;  %v129_v16 = vpop.f32.mrb[0].mxu1 }
 0x106   :  { %134 = vst [vmem:[#allocation7] sm:$0xff] %v123_v15  ;;  %137 = vst [vmem:[#allocation7 + $0x10] sm:$0xff] %v129_v16  ;;  %v125_v17 = vpop.f32.mrb[1].mxu0  ;;  %v131_v18 = vpop.f32.mrb[1].mxu1 }
 0x107   :  { %136 = vst.msk [vmem:[#allocation7 + $0x8] sm:$0xff] %vm135_vm1, %v125_v17  ;;  %138 = vst.msk [vmem:[#allocation7 + $0x18] sm:$0xff] %vm135_vm1, %v131_v18 }
 0x108   :  { %234 = shalt.err (!%p231_p6)
}
 0x109   :  { %s235_s12 = scalar_lea.hbm %s318_s2, 512 }
 0x10a   :  { %p236_p7 = scmp.ne.s32.totalorder %s318_s2, %s235_s12  ;;  %p239_p8 = scmp.lt.u32.totalorder %s235_s12, %s318_s2 }
 0x10c   :  { %p241_p9 = pnand %p239_p8, %p236_p7 }
 0x10e   :  { %244 = shalt.err (!%p241_p9)
}
 0x10f   :  { %150 = dma.vmem_to_hbm [thread:$0]  %s145_s8, 512, %s318_s2, [#allocation4], %s255_s0, %s255_s0, %s256_s5  }
 0x110   :  { %249 = dma.done.wait [#allocation4], 512  }
 0x111   :  { %250 = vsyncadd [#allocation4], 4294966784 }
 0x112   :  { %154 = vsyncpa [#allocation3], 1 }
 0x113   :  { %155 = vsyncpa [#allocation6], 1 }
 0x114   :  { %156 = vsyncpa [#allocation4], 1 }

</bundles_post_ra>
